<compile_context>
chip_gen: v7x
topology: tpu7x:2x2x1
jax: 0.10.0
libtpu: 0.0.40
codegen_flags: <defaults>
</compile_context>

<pallas_src>
import math

import numpy as np
import jax
import jax.numpy as jnp
from jax.experimental import pallas as pl
from jax.experimental.pallas import tpu as pltpu


# ----------------------------------------------------------------------------
# Pallas kernel: fused (actor || critic) MLP + diagonal-MVN log_prob
# ----------------------------------------------------------------------------
def actor_critic_kernel(
    state_ref, action_ref,                       # (TB, S), (TB, A)
    w1_ref, b1_ref,                              # (S, 128), (1, 128)   [actor | critic]
    w2_ref, b2_ref,                              # (128, 64), (1, 64)   block-diag
    w3_ref, b3_ref,                              # (64, A+1), (1, A+1)  block-diag
    inv_var_ref, const_ref,                      # (1, A), (1, 1)       hoisted MVN consts
    out_ref,                                     # (TB, OUT_W) packed [mean | logp | val | pad]
):
    x = state_ref[...]                           # (TB, S) f32
    act = action_ref[...]                        # (TB, A) f32
    A = act.shape[-1]

    # Fused actor/critic trunk: 3 matmuls on 128 / 64 / (A+1)-wide outputs.
    h = jnp.tanh(jnp.dot(x, w1_ref[...], preferred_element_type=jnp.float32) + b1_ref[...])
    h = jnp.tanh(jnp.dot(h, w2_ref[...], preferred_element_type=jnp.float32) + b2_ref[...])
    y = jnp.dot(h, w3_ref[...], preferred_element_type=jnp.float32) + b3_ref[...]   # (TB, A+1)

    action_mean = jnp.tanh(y[:, :A])             # actor head (tanh output layer)
    state_value = y[:, A:A + 1]                  # critic head (no tanh)

    # Diagonal-MVN log_prob with all batch-constant terms precomputed host-side:
    #   logp = -0.5*(k*log(2pi) + logdet) - 0.5 * sum(diff^2 / var)
    diff = act - action_mean
    logp = const_ref[...] - 0.5 * jnp.sum(
        diff * diff * inv_var_ref[...], axis=-1, keepdims=True
    )                                            # (TB, 1)

    # Single packed store: [mean(A) | logp | val | zero-pad].
    pad = out_ref.shape[-1] - (A + 2)
    pieces = [action_mean, logp, state_value]
    if pad > 0:
        pieces.append(jnp.zeros((action_mean.shape[0], pad), jnp.float32))
    out_ref[...] = jnp.concatenate(pieces, axis=-1)


# ----------------------------------------------------------------------------
# Parameter construction (PyTorch nn.Linear convention, weights pre-transposed)
# ----------------------------------------------------------------------------
def init_params(key, state_dim, action_dim, action_std):
    def linear(k, fan_in, fan_out):
        kw, kb = jax.random.split(k)
        bound = 1.0 / math.sqrt(fan_in)
        w = jax.random.uniform(kw, (fan_in, fan_out), jnp.float32, -bound, bound)
        b = jax.random.uniform(kb, (1, fan_out), jnp.float32, -bound, bound)
        return w, b

    keys = jax.random.split(key, 6)
    aw1, ab1 = linear(keys[0], state_dim, 64)
    aw2, ab2 = linear(keys[1], 64, 32)
    aw3, ab3 = linear(keys[2], 32, action_dim)
    cw1, cb1 = linear(keys[3], state_dim, 64)
    cw2, cb2 = linear(keys[4], 64, 32)
    cw3, cb3 = linear(keys[5], 32, 1)
    action_var = jnp.full((1, action_dim), action_std * action_std, jnp.float32)
    return dict(
        aw1=aw1, ab1=ab1, aw2=aw2, ab2=ab2, aw3=aw3, ab3=ab3,
        cw1=cw1, cb1=cb1, cw2=cw2, cb2=cb2, cw3=cw3, cb3=cb3,
        action_var=action_var,
    )


def fuse_params(p):
    """One-time host-side fusion: actor||critic weights + hoisted MVN constants."""
    A = p["aw3"].shape[1]

    w1 = jnp.concatenate([p["aw1"], p["cw1"]], axis=1)                 # (S, 128)
    b1 = jnp.concatenate([p["ab1"], p["cb1"]], axis=1)                 # (1, 128)

    w2 = jnp.zeros((128, 64), jnp.float32)
    w2 = w2.at[:64, :32].set(p["aw2"]).at[64:, 32:].set(p["cw2"])      # block-diag (128, 64)
    b2 = jnp.concatenate([p["ab2"], p["cb2"]], axis=1)                 # (1, 64)

    w3 = jnp.zeros((64, A + 1), jnp.float32)
    w3 = w3.at[:32, :A].set(p["aw3"]).at[32:, A:].set(p["cw3"])        # block-diag (64, A+1)
    b3 = jnp.concatenate([p["ab3"], p["cb3"]], axis=1)                 # (1, A+1)

    var = p["action_var"]                                              # (1, A)
    k = float(A)
    log2pi = math.log(2.0 * math.pi)
    logdet = jnp.sum(jnp.log(var))
    inv_var = 1.0 / var
    const = jnp.reshape(-0.5 * (k * log2pi + logdet), (1, 1)).astype(jnp.float32)
    entropy = (0.5 * k * (1.0 + log2pi) + 0.5 * logdet).astype(jnp.float32)

    return dict(w1=w1, b1=b1, w2=w2, b2=b2, w3=w3, b3=b3,
                inv_var=inv_var, const=const, entropy=entropy)


# ----------------------------------------------------------------------------
# Wrapper: batch-tiled pallas_call
# ----------------------------------------------------------------------------
def actor_critic_evaluate(state, action, fused, *, tile_b=1024):
    """Pallas-fused ActorCritic.evaluate(state, action).

    Returns (action_logprobs (B,), state_value (B,), dist_entropy (B,)),
    matching the PyTorch module's evaluate() signature.
    """
    B, S = state.shape
    _, A = action.shape
    OUT_W = max(8, ((A + 2 + 7) // 8) * 8)        # packed [mean | logp | val | pad]

    # Batch tile: multiple of 8 sublanes; full (padded) batch if it is small.
    # TODO(synk): for v6e/v7x, cast w*/h to bf16 for the matmuls (f32 accumulate)
    # once the deployed batch is large enough to be MXU-bound.
    TB = tile_b if B >= tile_b else ((B + 7) // 8) * 8
    B_pad = ((B + TB - 1) // TB) * TB
    if B_pad != B:
        state = jnp.pad(state, ((0, B_pad - B), (0, 0)))
        action = jnp.pad(action, ((0, B_pad - B), (0, 0)))
    n_blocks = B_pad // TB

    def batched(width):
        return pl.BlockSpec((TB, width), lambda i: (i, 0))

    def resident(arr):
        # Full array as one block, same block every grid step -> stays in VMEM.
        return pl.BlockSpec(arr.shape, lambda i: (0, 0))

    packed = pl.pallas_call(
        actor_critic_kernel,
        out_shape=jax.ShapeDtypeStruct((B_pad, OUT_W), jnp.float32),
        grid_spec=pltpu.PrefetchScalarGridSpec(
            num_scalar_prefetch=0,
            grid=(n_blocks,),
            in_specs=[
                batched(S), batched(A),
                resident(fused["w1"]), resident(fused["b1"]),
                resident(fused["w2"]), resident(fused["b2"]),
                resident(fused["w3"]), resident(fused["b3"]),
                resident(fused["inv_var"]), resident(fused["const"]),
            ],
            out_specs=pl.BlockSpec((TB, OUT_W), lambda i: (i, 0)),
        ),
        compiler_params=pltpu.CompilerParams(
            dimension_semantics=("parallel",),     # shards batch tiles across v7x's 2 TCs
        ),
    )(state, action, fused["w1"], fused["b1"], fused["w2"], fused["b2"],
      fused["w3"], fused["b3"], fused["inv_var"], fused["const"])

    action_logprobs = packed[:B, A]
    state_value = packed[:B, A + 1]
    dist_entropy = jnp.full((B,), fused["entropy"], jnp.float32)   # batch-constant
    return action_logprobs, state_value, dist_entropy


# ----------------------------------------------------------------------------
# Pure-JAX reference (unfused) for verification
# ----------------------------------------------------------------------------
def reference_evaluate(state, action, p):
    h = jnp.tanh(state @ p["aw1"] + p["ab1"])
    h = jnp.tanh(h @ p["aw2"] + p["ab2"])
    mean = jnp.tanh(h @ p["aw3"] + p["ab3"])

    g = jnp.tanh(state @ p["cw1"] + p["cb1"])
    g = jnp.tanh(g @ p["cw2"] + p["cb2"])
    val = g @ p["cw3"] + p["cb3"]

    var = p["action_var"]
    k = var.shape[-1]
    log2pi = math.log(2.0 * math.pi)
    logdet = jnp.sum(jnp.log(var))
    diff = action - mean
    maha = jnp.sum(diff * diff / var, axis=-1)
    logp = -0.5 * (k * log2pi + logdet + maha)
    ent = jnp.full_like(logp, 0.5 * k * (1.0 + log2pi) + 0.5 * logdet)
    return logp, val[:, 0], ent


if __name__ == "__main__":
    STATE_DIM, ACTION_DIM, ACTION_STD = 16, 4, 0.5

    key = jax.random.PRNGKey(0)
    k_params, k_data = jax.random.split(key)
    params = init_params(k_params, STATE_DIM, ACTION_DIM, ACTION_STD)
    fused = fuse_params(params)

    # Case 1: small batch, single grid step.  Case 2: multi-step grid + batch padding.
    for case_id, (B, tb) in enumerate([(8, 1024), (30, 8)]):
        ks, ka = jax.random.split(jax.random.fold_in(k_data, case_id))
        state = jax.random.normal(ks, (B, STATE_DIM), jnp.float32)
        action = jax.random.normal(ka, (B, ACTION_DIM), jnp.float32)

        logp, val, ent = actor_critic_evaluate(state, action, fused, tile_b=tb)
        jax.block_until_ready((logp, val, ent))

        r_logp, r_val, r_ent = reference_evaluate(state, action, params)
        np.testing.assert_allclose(np.asarray(logp), np.asarray(r_logp), rtol=2e-5, atol=2e-5)
        np.testing.assert_allclose(np.asarray(val), np.asarray(r_val), rtol=2e-5, atol=2e-5)
        np.testing.assert_allclose(np.asarray(ent), np.asarray(r_ent), rtol=2e-5, atol=2e-5)

    # TODO(synk): act()'s dist.sample() + memory-buffer appends are host-side RL
    # plumbing; sampling can be done in plain JAX from the actor mean + action_var.
    print("KERNEL_OK")
</pallas_src>

<mosaic_0001>
module attributes {stable_mosaic.version = 11 : i64} {
  func.func @actor_critic_kernel(%arg0: i32, %arg1: memref<8x16xf32, #tpu.memory_space<vmem>>, %arg2: memref<8x4xf32, #tpu.memory_space<vmem>>, %arg3: memref<16x128xf32, #tpu.memory_space<vmem>>, %arg4: memref<1x128xf32, #tpu.memory_space<vmem>>, %arg5: memref<128x64xf32, #tpu.memory_space<vmem>>, %arg6: memref<1x64xf32, #tpu.memory_space<vmem>>, %arg7: memref<64x5xf32, #tpu.memory_space<vmem>>, %arg8: memref<1x5xf32, #tpu.memory_space<vmem>>, %arg9: memref<1x4xf32, #tpu.memory_space<vmem>>, %arg10: memref<1x1xf32, #tpu.memory_space<vmem>>, %arg11: memref<8x8xf32, #tpu.memory_space<vmem>>) attributes {dimension_semantics = [#tpu.dimension_semantics<parallel>], iteration_bounds = array<i64: 1>, scalar_prefetch = 0 : i64, scratch_operands = 0 : i64, tpu.core_type = #tpu.core_type<tc>, window_params = [{transform_indices = @transform_0, window_bounds = array<i64: 8, 16>}, {transform_indices = @transform_1, window_bounds = array<i64: 8, 4>}, {pipeline_mode = #tpu.pipeline_mode<synchronous>, transform_indices = @transform_2, window_bounds = array<i64: 16, 128>}, {pipeline_mode = #tpu.pipeline_mode<synchronous>, transform_indices = @transform_3, window_bounds = array<i64: 1, 128>}, {pipeline_mode = #tpu.pipeline_mode<synchronous>, transform_indices = @transform_4, window_bounds = array<i64: 128, 64>}, {pipeline_mode = #tpu.pipeline_mode<synchronous>, transform_indices = @transform_5, window_bounds = array<i64: 1, 64>}, {pipeline_mode = #tpu.pipeline_mode<synchronous>, transform_indices = @transform_6, window_bounds = array<i64: 64, 5>}, {pipeline_mode = #tpu.pipeline_mode<synchronous>, transform_indices = @transform_7, window_bounds = array<i64: 1, 5>}, {pipeline_mode = #tpu.pipeline_mode<synchronous>, transform_indices = @transform_8, window_bounds = array<i64: 1, 4>}, {pipeline_mode = #tpu.pipeline_mode<synchronous>, transform_indices = @transform_9, window_bounds = array<i64: 1, 1>}, {transform_indices = @transform_10, window_bounds = array<i64: 8, 8>}]} {
    %c0 = arith.constant 0 : index
    %c0_0 = arith.constant 0 : index
    %0 = vector.load %arg1[%c0, %c0_0] : memref<8x16xf32, #tpu.memory_space<vmem>>, vector<8x16xf32>
    %c0_1 = arith.constant 0 : index
    %c0_2 = arith.constant 0 : index
    %1 = vector.load %arg2[%c0_1, %c0_2] : memref<8x4xf32, #tpu.memory_space<vmem>>, vector<8x4xf32>
    %c0_3 = arith.constant 0 : index
    %c0_4 = arith.constant 0 : index
    %2 = vector.load %arg3[%c0_3, %c0_4] : memref<16x128xf32, #tpu.memory_space<vmem>>, vector<16x128xf32>
    %cst = arith.constant dense<0.000000e+00> : vector<8x128xf32>
    %3 = tpu.matmul %0, %2, %cst {dimension_numbers = #tpu.dot_dimension_numbers<[1], [0], [0], [1], [0, 0, 1, 1], [], []>} : vector<8x16xf32>, vector<16x128xf32>, vector<8x128xf32> -> vector<8x128xf32>
    %c0_5 = arith.constant 0 : index
    %c0_6 = arith.constant 0 : index
    %4 = vector.load %arg4[%c0_5, %c0_6] : memref<1x128xf32, #tpu.memory_space<vmem>>, vector<1x128xf32>
    %5 = vector.broadcast %4 : vector<1x128xf32> to vector<8x128xf32>
    %6 = arith.addf %3, %5 : vector<8x128xf32>
    %7 = math.tanh %6 : vector<8x128xf32>
    %c0_7 = arith.constant 0 : index
    %c0_8 = arith.constant 0 : index
    %8 = vector.load %arg5[%c0_7, %c0_8] : memref<128x64xf32, #tpu.memory_space<vmem>>, vector<128x64xf32>
    %cst_9 = arith.constant dense<0.000000e+00> : vector<8x64xf32>
    %9 = tpu.matmul %7, %8, %cst_9 {dimension_numbers = #tpu.dot_dimension_numbers<[1], [0], [0], [1], [0, 0, 1, 1], [], []>} : vector<8x128xf32>, vector<128x64xf32>, vector<8x64xf32> -> vector<8x64xf32>
    %c0_10 = arith.constant 0 : index
    %c0_11 = arith.constant 0 : index
    %10 = vector.load %arg6[%c0_10, %c0_11] : memref<1x64xf32, #tpu.memory_space<vmem>>, vector<1x64xf32>
    %11 = vector.broadcast %10 : vector<1x64xf32> to vector<8x64xf32>
    %12 = arith.addf %9, %11 : vector<8x64xf32>
    %13 = math.tanh %12 : vector<8x64xf32>
    %c0_12 = arith.constant 0 : index
    %c0_13 = arith.constant 0 : index
    %14 = vector.load %arg7[%c0_12, %c0_13] : memref<64x5xf32, #tpu.memory_space<vmem>>, vector<64x5xf32>
    %cst_14 = arith.constant dense<0.000000e+00> : vector<8x5xf32>
    %15 = tpu.matmul %13, %14, %cst_14 {dimension_numbers = #tpu.dot_dimension_numbers<[1], [0], [0], [1], [0, 0, 1, 1], [], []>} : vector<8x64xf32>, vector<64x5xf32>, vector<8x5xf32> -> vector<8x5xf32>
    %c0_15 = arith.constant 0 : index
    %c0_16 = arith.constant 0 : index
    %16 = vector.load %arg8[%c0_15, %c0_16] : memref<1x5xf32, #tpu.memory_space<vmem>>, vector<1x5xf32>
    %17 = vector.broadcast %16 : vector<1x5xf32> to vector<8x5xf32>
    %18 = arith.addf %15, %17 : vector<8x5xf32>
    %19 = vector.extract_strided_slice %18 {offsets = [0, 0], sizes = [8, 4], strides = [1, 1]} : vector<8x5xf32> to vector<8x4xf32>
    %20 = math.tanh %19 : vector<8x4xf32>
    %21 = vector.extract_strided_slice %18 {offsets = [0, 4], sizes = [8, 1], strides = [1, 1]} : vector<8x5xf32> to vector<8x1xf32>
    %22 = arith.subf %1, %20 : vector<8x4xf32>
    %c0_17 = arith.constant 0 : index
    %c0_18 = arith.constant 0 : index
    %23 = vector.load %arg10[%c0_17, %c0_18] : memref<1x1xf32, #tpu.memory_space<vmem>>, vector<1x1xf32>
    %24 = arith.mulf %22, %22 : vector<8x4xf32>
    %c0_19 = arith.constant 0 : index
    %c0_20 = arith.constant 0 : index
    %25 = vector.load %arg9[%c0_19, %c0_20] : memref<1x4xf32, #tpu.memory_space<vmem>>, vector<1x4xf32>
    %26 = vector.broadcast %25 : vector<1x4xf32> to vector<8x4xf32>
    %27 = arith.mulf %24, %26 : vector<8x4xf32>
    %cst_21 = arith.constant dense<0.000000e+00> : vector<8xf32>
    %28 = vector.multi_reduction <add>, %27, %cst_21 [1] : vector<8x4xf32> to vector<8xf32>
    %29 = vector.shape_cast %28 : vector<8xf32> to vector<8x1xf32>
    %cst_22 = arith.constant 5.000000e-01 : f32
    %30 = vector.broadcast %cst_22 : f32 to vector<8x1xf32>
    %31 = arith.mulf %30, %29 : vector<8x1xf32>
    %32 = vector.broadcast %23 : vector<1x1xf32> to vector<8x1xf32>
    %33 = arith.subf %32, %31 : vector<8x1xf32>
    %cst_23 = arith.constant 0.000000e+00 : f32
    %34 = vector.broadcast %cst_23 : f32 to vector<8x2xf32>
    %35 = tpu.concatenate %20, %33, %21, %34 in 1 : vector<8x4xf32>, vector<8x1xf32>, vector<8x1xf32>, vector<8x2xf32> -> vector<8x8xf32>
    %c0_24 = arith.constant 0 : index
    %c0_25 = arith.constant 0 : index
    %36 = vector.load %arg11[%c0_24, %c0_25] : memref<8x8xf32, #tpu.memory_space<vmem>>, vector<8x8xf32>
    tpu.vector_store %arg11[%c0_24, %c0_25], %35 {strides = array<i32>} : memref<8x8xf32, #tpu.memory_space<vmem>>, vector<8x8xf32>,
    return
  }
  func.func @transform_0(%arg0: i32) -> (i32, i32) {
    %c0_i32 = arith.constant 0 : i32
    %c0_i32_0 = arith.constant 0 : i32
    return %arg0, %c0_i32 : i32, i32
  }
  func.func @transform_1(%arg0: i32) -> (i32, i32) {
    %c0_i32 = arith.constant 0 : i32
    %c0_i32_0 = arith.constant 0 : i32
    return %arg0, %c0_i32 : i32, i32
  }
  func.func @transform_2(%arg0: i32) -> (i32, i32) {
    %c0_i32 = arith.constant 0 : i32
    %c0_i32_0 = arith.constant 0 : i32
    %c0_i32_1 = arith.constant 0 : i32
    return %c0_i32, %c0_i32_0 : i32, i32
  }
  func.func @transform_3(%arg0: i32) -> (i32, i32) {
    %c0_i32 = arith.constant 0 : i32
    %c0_i32_0 = arith.constant 0 : i32
    %c0_i32_1 = arith.constant 0 : i32
    return %c0_i32, %c0_i32_0 : i32, i32
  }
  func.func @transform_4(%arg0: i32) -> (i32, i32) {
    %c0_i32 = arith.constant 0 : i32
    %c0_i32_0 = arith.constant 0 : i32
    %c0_i32_1 = arith.constant 0 : i32
    return %c0_i32, %c0_i32_0 : i32, i32
  }
  func.func @transform_5(%arg0: i32) -> (i32, i32) {
    %c0_i32 = arith.constant 0 : i32
    %c0_i32_0 = arith.constant 0 : i32
    %c0_i32_1 = arith.constant 0 : i32
    return %c0_i32, %c0_i32_0 : i32, i32
  }
  func.func @transform_6(%arg0: i32) -> (i32, i32) {
    %c0_i32 = arith.constant 0 : i32
    %c0_i32_0 = arith.constant 0 : i32
    %c0_i32_1 = arith.constant 0 : i32
    return %c0_i32, %c0_i32_0 : i32, i32
  }
  func.func @transform_7(%arg0: i32) -> (i32, i32) {
    %c0_i32 = arith.constant 0 : i32
    %c0_i32_0 = arith.constant 0 : i32
    %c0_i32_1 = arith.constant 0 : i32
    return %c0_i32, %c0_i32_0 : i32, i32
  }
  func.func @transform_8(%arg0: i32) -> (i32, i32) {
    %c0_i32 = arith.constant 0 : i32
    %c0_i32_0 = arith.constant 0 : i32
    %c0_i32_1 = arith.constant 0 : i32
    return %c0_i32, %c0_i32_0 : i32, i32
  }
  func.func @transform_9(%arg0: i32) -> (i32, i32) {
    %c0_i32 = arith.constant 0 : i32
    %c0_i32_0 = arith.constant 0 : i32
    %c0_i32_1 = arith.constant 0 : i32
    return %c0_i32, %c0_i32_0 : i32, i32
  }
  func.func @transform_10(%arg0: i32) -> (i32, i32) {
    %c0_i32 = arith.constant 0 : i32
    %c0_i32_0 = arith.constant 0 : i32
    return %arg0, %c0_i32 : i32, i32
  }
}

</mosaic_0001>

<bundles_post_ra>
// kernel: tpu_custom_call.1
= control target key start
LH: loop header
LB: loop body
LE: loop exit
PB: predicated region body
PF: predicated region fallthrough
CT: control target
= control target key end

     0   :  { %s722_s0 = inlined_call_operand.vmem [shape: f32[8,16], index: 0, kind: input, shape index: {}]   ;;  %s723_s1 = inlined_call_operand.vmem [shape: f32[8,4], index: 1, kind: input, shape index: {}]   ;;  %s724_s2 = inlined_call_operand.vmem [shape: f32[16,128], index: 2, kind: input, shape index: {}]   ;;  %s725_s3 = inlined_call_operand.vmem [shape: f32[1,128], index: 3, kind: input, shape index: {}]   ;;  %s726_s4 = inlined_call_operand.vmem [shape: f32[128,64], index: 4, kind: input, shape index: {}]   ;;  %s727_s5 = inlined_call_operand.vmem [shape: f32[1,64], index: 5, kind: input, shape index: {}]   ;;  %s728_s6 = inlined_call_operand.vmem [shape: f32[64,5], index: 6, kind: input, shape index: {}]   ;;  %s729_s7 = inlined_call_operand.vmem [shape: f32[1,5], index: 7, kind: input, shape index: {}]   ;;  %s730_s8 = inlined_call_operand.vmem [shape: f32[1,4], index: 8, kind: input, shape index: {}]   ;;  %s731_s9 = inlined_call_operand.<no memory space> [shape: f32[1,1], index: 9, kind: input, shape index: {}]   ;;  %s732_s10 = inlined_call_operand.hbm [shape: f32[8,8], index: 10, kind: output, shape index: {}]  }
   0x1   :  { %v15_v0 = vstv %s731_s9 }
   0x2   :  { %16 = vst [vmem:[#allocation2] sm:$0x1] %v15_v0 }
   0x3   :  { %v40_v1 = vld [vmem:[%s724_s2] sm:$0xff]  ;;  %v41_v2 = vld [vmem:[%s724_s2 + $0x8] sm:$0xff]  ;;  %v532_v3 = vmov 0.0|0.0   ;;  %vm533_vm0 = vmmov 0   ;;  %v534_v5 = vmov 0.0   ;;  %v126_v8 = vld [vmem:[%s726_s4 + $0x10] sm:$0xff] }
   0x4   :  { %457 = vmatprep.subr.bf16.mxu0 %v532_v3  ;;  %v458_v4 = vpack.c.bf16 %v41_v2, %v40_v1  ;;  %400 = vmatprep.mubr.msk.f32.mxu0 %vm533_vm0, %v534_v5  ;;  %v124_v6 = vld [vmem:[%s726_s4] sm:$0xff]  ;;  %v125_v7 = vld [vmem:[%s726_s4 + $0x8] sm:$0xff]  ;;  %v127_v10 = vld [vmem:[%s726_s4 + $0x18] sm:$0xff]  ;;  %vm49_vm1 = vcmask 130048  }
   0x5   :  { %460 = vmatprep.subr.bf16.mxu1 %v532_v3  ;;  %v461_v9 = vpack.c.bf16 %v125_v7, %v124_v6  ;;  %435 = vmatprep.mubr.msk.f32.mxu1 %vm533_vm0, %v534_v5  ;;  %v38_v11 = vld [vmem:[%s722_s0] sm:$0xff]  ;;  %v464_v12 = vpack.c.bf16 %v127_v10, %v126_v8 }
   0x6   :  { %459 = vmatpush3.bf16.msra.mxu0 %v458_v4 }
   0x7   :  { %462 = vmatpush3.bf16.msra.mxu1 %v461_v9  ;;  %484 = vmatprep.subr.bf16.mxu0 %v532_v3 }
   0x8   :  { %17 = vsyncpa [#allocation4], 0  ;;  %463 = vmatprep.subr.bf16.mxu1 %v532_v3  ;;  %v128_v13 = vld [vmem:[%s726_s4 + $0x20] sm:$0xff]  ;;  %v129_v14 = vld [vmem:[%s726_s4 + $0x28] sm:$0xff]  ;;  %vm233_vm2 = vcmask 523264   ;;  %vm319_vm3 = vcmask 31744  }
   0x9   :  { %401 = vmatmul.mubr.msk.f32.vlgmr.msra.gmra.mrb[0].mxu0 %vm49_vm1, %v38_v11  ;;  %v467_v15 = vpack.c.bf16 %v129_v14, %v128_v13  ;;  %v130_v16 = vld [vmem:[%s726_s4 + $0x30] sm:$0xff]  ;;  %v131_v17 = vld [vmem:[%s726_s4 + $0x38] sm:$0xff]  ;;  %v132_v19 = vld [vmem:[%s726_s4 + $0x40] sm:$0xff]  ;;  %vm340_vm4 = vcmask 39936   ;;  %vm342_vm5 = vcmask 48128   ;;  %vm344_vm6 = vcmask 64512  }
   0xa   :  { %454 = vmatprep.mubr.msk.f32.mxu0 %vm533_vm0, %v534_v5  ;;  %v470_v18 = vpack.c.bf16 %v131_v17, %v130_v16  ;;  %v133_v20 = vld [vmem:[%s726_s4 + $0x48] sm:$0xff]  ;;  %v134_v22 = vld [vmem:[%s726_s4 + $0x50] sm:$0xff]  ;;  %v135_v23 = vld [vmem:[%s726_s4 + $0x58] sm:$0xff] }
   0xb   :  { %465 = vmatpush3.bf16.msra.mxu1 %v464_v12  ;;  %v473_v21 = vpack.c.bf16 %v133_v20, %v132_v19  ;;  %v476_v24 = vpack.c.bf16 %v135_v23, %v134_v22  ;;  %v136_v25 = vld [vmem:[%s726_s4 + $0x60] sm:$0xff]  ;;  %v137_v26 = vld [vmem:[%s726_s4 + $0x68] sm:$0xff]  ;;  %v138_v28 = vld [vmem:[%s726_s4 + $0x70] sm:$0xff] }
   0xc   :  { %466 = vmatprep.subr.bf16.mxu1 %v532_v3  ;;  %v479_v27 = vpack.c.bf16 %v137_v26, %v136_v25  ;;  %v139_v29 = vld [vmem:[%s726_s4 + $0x78] sm:$0xff]  ;;  %v218_v31 = vld [vmem:[%s728_s6] sm:$0xff]  ;;  %v219_v32 = vld [vmem:[%s728_s6 + $0x8] sm:$0xff] }
   0xd   :  { %v482_v30 = vpack.c.bf16 %v139_v29, %v138_v28  ;;  %v485_v33 = vpack.c.bf16 %v219_v32, %v218_v31  ;;  %v360_v34 = vld [vmem:[%s725_s3] ss:$0 sm:$0xff]  ;;  %v220_v39 = vld [vmem:[%s728_s6 + $0x10] sm:$0xff]  ;;  %v221_v40 = vld [vmem:[%s728_s6 + $0x18] sm:$0xff] }
   0xe   :  { %v488_v41 = vpack.c.bf16 %v221_v40, %v220_v39  ;;  %v222_v42 = vld [vmem:[%s728_s6 + $0x20] sm:$0xff]  ;;  %v223_v43 = vld [vmem:[%s728_s6 + $0x28] sm:$0xff]  ;;  %v224_v45 = vld [vmem:[%s728_s6 + $0x30] sm:$0xff] }
   0xf   :  { %468 = vmatpush3.bf16.msra.mxu1 %v467_v15  ;;  %486 = vmatpush3.bf16.msra.mxu0 %v485_v33  ;;  %v491_v44 = vpack.c.bf16 %v223_v43, %v222_v42  ;;  %v225_v46 = vld [vmem:[%s728_s6 + $0x38] sm:$0xff]  ;;  %v362_v48 = vld [vmem:[%s727_s5] ss:$0 sm:$0xff]  ;;  %s535_s6 = smov 1  }
  0x10   :  { %469 = vmatprep.subr.bf16.mxu1 %v532_v3  ;;  %487 = vmatprep.subr.bf16.mxu0 %v532_v3  ;;  %v494_v47 = vpack.c.bf16 %v225_v46, %v224_v45  ;;  %v363_v53 = vld [vmem:[%s729_s7] ss:$0 sm:$0xff]  ;;  %s536_s7 = smov 4  }
  0x11   :  { %v39_v57 = vld [vmem:[%s723_s1] sm:$0xff]  ;;  %s537_s1 = smov [#allocation3]  }
  0x12   :  { %v365_v60 = vld [vmem:[%s730_s8] ss:$0 sm:$0xff]  ;;  %s352_s28 = sshll.u32 %s537_s1, 4  ;;  %s353_s28 = int_to_ptr.vmem [resolvable:$true] %s352_s28 }
  0x13   :  { %471 = vmatpush3.bf16.msra.mxu1 %v470_v18  ;;  %489 = vmatpush3.bf16.msra.mxu0 %v488_v41  ;;  %v366_v0 = vld [vmem:[#allocation2] ss:$0 sm:$0xff]  ;;  %s508_s8 = scalar_lea.vmem %s353_s28, 128  ;;  %p513_p1 = scmp.lt.s32.totalorder %s353_s28, %s353_s28 }
  0x14   :  { %472 = vmatprep.subr.bf16.mxu1 %v532_v3  ;;  %490 = vmatprep.subr.bf16.mxu0 %v532_v3  ;;  %p509_p0 = scmp.ne.s32.totalorder %s353_s28, %s508_s8  ;;  %p514_p2 = scmp.lt.s32.totalorder %s508_s8, %s508_s8 }
  0x16   :  { %p515_p3 = por %p514_p2, %p513_p1 }
  0x17   :  { %474 = vmatpush3.bf16.msra.mxu1 %v473_v21  ;;  %492 = vmatpush3.bf16.msra.mxu0 %v491_v44 }
  0x18   :  { %475 = vmatprep.subr.bf16.mxu1 %v532_v3  ;;  %493 = vmatprep.subr.bf16.mxu0 %v532_v3  ;;  %p516_p4 = pnand %p515_p3, %p509_p0 }
  0x1b   :  { %477 = vmatpush3.bf16.msra.mxu1 %v476_v24  ;;  %495 = vmatpush3.bf16.msra.mxu0 %v494_v47 }
  0x1c   :  { %478 = vmatprep.subr.bf16.mxu1 %v532_v3 }
  0x1f   :  { %480 = vmatpush3.bf16.msra.mxu1 %v479_v27 }
  0x20   :  { %481 = vmatprep.subr.bf16.mxu1 %v532_v3 }
  0x23   :  { %483 = vmatpush3.bf16.msra.mxu1 %v482_v30 }
  0xdc   :  { %v119_v35 = vpop.f32.mrb[0].mxu0 }
  0xdd   :  { %v120_v36 = vadd.f32 %v360_v34, %v119_v35  ;;  %v402_v37 = vpop.f32.mrb[1].mxu0 }
  0xdf   :  { %502 = vtanh.f32 %v120_v36 }
  0xe9   :  { %v503_v38 = vpop.eup %502 }
  0xea   :  { %436 = vmatmul.mubr.f32.vlgmr.msra.gmra.mrb[0].mxu1 %v503_v38 }
 0x1bd   :  { %v213_v49 = vpop.f32.mrb[0].mxu1 }
 0x1be   :  { %v214_v50 = vadd.f32 %v362_v48, %v213_v49  ;;  %v437_v51 = vpop.f32.mrb[1].mxu1 }
 0x1c0   :  { %504 = vtanh.f32 %v214_v50 }
 0x1ca   :  { %v505_v52 = vpop.eup %504 }
 0x1cb   :  { %455 = vmatmul.mubr.msk.f32.vlgmr.msra.gmra.mrb[2].mxu0 %vm233_vm2, %v505_v52 }
 0x29e   :  { %v303_v54 = vpop.f32.mrb[2].mxu0 }
 0x29f   :  { %v304_v55 = vadd.f32 %v363_v53, %v303_v54  ;;  %v456_v56 = vpop.f32.mrb[3].mxu0 }
 0x2a1   :  { %506 = vtanh.f32 %v304_v55  ;;  %336 = vrot.lane.b32.xlu1 %v304_v55, %s535_s6 }
 0x2ab   :  { %v507_v58 = vpop.eup %506 }
 0x2ac   :  { %v308_v59 = vsub.f32 %v39_v57, %v507_v58 }
 0x2ae   :  { %v310_v61 = vmul.f32 %v308_v59, %v308_v59 }
 0x2b0   :  { %v318_v62 = vmul.f32 %v365_v60, %v310_v61 }
 0x2b2   :  { %v320_v63 = vsel %vm319_vm3, %v318_v62, 0.0 }
 0x2b3   :  { %321 = vadd.xlane.f32.xlu0 %v320_v63 }
 0x313   :  { %v337_v5 = vpop.permute.xlu1 %336 }
 0x340   :  { %v322_v1 = vpop.xlane.xlu0 %321 }
 0x341   :  { %v323_v2 = vmul.f32 0.5, %v322_v1 }
 0x343   :  { %v330_v3 = vsub.f32 %v366_v0, %v323_v2 }
 0x345   :  { %332 = vrot.lane.b32.xlu0 %v330_v3, %s536_s7 }
 0x3b7   :  { %v333_v4 = vpop.permute.xlu0 %332 }
 0x3b8   :  { %v339_v6 = vsel %vm319_vm3, %v507_v58, %v333_v4 }
 0x3b9   :  { %v341_v7 = vsel %vm340_vm4, %v339_v6, %v337_v5 }
 0x3ba   :  { %v343_v8 = vsel %vm342_vm5, %v341_v7, 0.0 }
 0x3bb   :  { %345 = vst.msk [vmem:[#allocation3] sm:$0xff] %vm344_vm6, %v343_v8 }
 0x3bc   :  { %519 = shalt.err (!%p516_p4)
}
 0x3bd   :  { %s520_s0 = scalar_lea.hbm %s732_s10, 128 }
 0x3be   :  { %p521_p5 = scmp.ne.s32.totalorder %s732_s10, %s520_s0  ;;  %p524_p6 = scmp.lt.u32.totalorder %s520_s0, %s732_s10 }
 0x3c0   :  { %p526_p7 = pnand %p524_p6, %p521_p5 }
 0x3c2   :  { %529 = shalt.err (!%p526_p7)
}
 0x3c3   :  { %355 = dma.vmem_to_hbm [thread:$0]  %s353_s28, 128, %s732_s10, [#allocation4]  }
 0x3c4   :  { %530 = dma.done.wait [#allocation4], 128  }
 0x3c5   :  { %531 = vsyncadd [#allocation4], 4294967168 }
 0x3c6   :  { %359 = vsyncpa [#allocation4], 1 }

</bundles_post_ra>
